<compile_context>
chip_gen: v7x
topology: tpu7x:2x2x1
jax: 0.10.0
libtpu: 0.0.40
codegen_flags: <defaults>
</compile_context>

<pallas_src>
import functools
import math

import jax
import jax.numpy as jnp
from jax.experimental import pallas as pl
from jax.experimental.pallas import tpu as pltpu


# ----------------------------------------------------------------------------
# Kernels
# ----------------------------------------------------------------------------
def _xw_kernel(x_ref, w1_ref, xw_ref):
    # XW_blk = X_blk @ W1   (bf16 in, f32 accumulate, bf16 out)
    xw_ref[...] = jnp.dot(
        x_ref[...], w1_ref[...], preferred_element_type=jnp.float32
    ).astype(jnp.bfloat16)


def _dequant_a(a_ref, a_inv_scale):
    # A is stored int8 (v5e/v6e) / fp8 (v7x) / bf16 (fallback); MXU operates in
    # bf16 with f32 accumulation either way -- the narrow dtype only exists to
    # halve HBM traffic on the bandwidth-bound aggregation.
    a = a_ref[...]
    if a.dtype != jnp.bfloat16:
        a = a.astype(jnp.bfloat16)
    if a_inv_scale != 1.0:
        a = a * jnp.asarray(a_inv_scale, jnp.bfloat16)
    return a


def _hw_kernel(a_ref, xw_ref, b1_ref, w2_ref, *rest, a_inv_scale, training):
    # grid = (row_blocks, k_blocks); k (node contraction) is the last axis.
    if training:
        drop_ref, hw_ref, acc_ref = rest
    else:
        hw_ref, acc_ref = rest

    k = pl.program_id(1)

    @pl.when(k == 0)
    def _init():
        acc_ref[...] = jnp.zeros_like(acc_ref)

    # acc += A_blk(i,k) @ XW_blk(k)
    acc_ref[...] += jnp.dot(_dequant_a(a_ref, a_inv_scale), xw_ref[...],
                            preferred_element_type=jnp.float32)

    @pl.when(k == pl.num_programs(1) - 1)
    def _finalize():
        h = jnp.maximum(acc_ref[...] + b1_ref[...], 0.0)
        h_bf = h.astype(jnp.bfloat16)
        if training:
            # drop_ref already carries the 1/(1-p) inverted-dropout scaling.
            h_bf = h_bf * drop_ref[...]
        hw_ref[...] = jnp.dot(
            h_bf, w2_ref[...], preferred_element_type=jnp.float32
        ).astype(jnp.bfloat16)


def _out_kernel(a_ref, hw_ref, b2_ref, out_ref, acc_ref, *, a_inv_scale):
    k = pl.program_id(1)

    @pl.when(k == 0)
    def _init():
        acc_ref[...] = jnp.zeros_like(acc_ref)

    acc_ref[...] += jnp.dot(_dequant_a(a_ref, a_inv_scale), hw_ref[...],
                            preferred_element_type=jnp.float32)

    @pl.when(k == pl.num_programs(1) - 1)
    def _finalize():
        out_ref[...] = acc_ref[...] + b2_ref[...]


# ----------------------------------------------------------------------------
# Per-generation configuration
# ----------------------------------------------------------------------------
def _round_up(x, m):
    return ((x + m - 1) // m) * m


def _pad2(x, r, c):
    return jnp.pad(x, ((0, r - x.shape[0]), (0, c - x.shape[1])))


def _tpu_generation():
    try:
        kind = jax.devices()[0].device_kind.lower()
    except Exception:
        return None
    for g in (7, 6, 5, 4):
        if f"v{g}" in kind:
            return g
    return None


def default_gcn_config():
    gen = _tpu_generation()
    if gen == 7:
        # v7x: 64 MiB VMEM, fp8-only narrow MXU path, 2 TCs -> keep tm modest
        # so the "parallel" row axis shards across both cores.
        return dict(tm=256, tk=512, a_dtype=jnp.float8_e4m3fn)
    if gen in (5, 6):
        # v5e / v6e: 128 MiB VMEM, int8 memory/MXU path, single TensorCore.
        return dict(tm=512, tk=512, a_dtype=jnp.int8)
    # Unknown hardware / CPU-interpret fallback: bf16 A, conservative tiles.
    return dict(tm=256, tk=256, a_dtype=jnp.bfloat16)


# ----------------------------------------------------------------------------
# Graph / parameter preparation (done ONCE, cached across forward calls)
# ----------------------------------------------------------------------------
def normalized_adjacency(edge_index, num_nodes):
    # Dense A_hat exactly like PyG GCNConv: add self-loops, symmetric D^-1/2
    # normalization, messages flow source (row) -> target (col).
    row, col = edge_index[0], edge_index[1]
    self_loops = jnp.arange(num_nodes, dtype=edge_index.dtype)
    row = jnp.concatenate([row, self_loops])
    col = jnp.concatenate([col, self_loops])
    a = jnp.zeros((num_nodes, num_nodes), jnp.float32).at[col, row].add(1.0)
    deg = a.sum(axis=1)
    dinv = jnp.where(deg > 0, 1.0 / jnp.sqrt(deg), 0.0)
    return dinv[:, None] * a * dinv[None, :]


def prepare_gcn(x, edge_index, params, *, config=None):
    """Build padded, kernel-dtype inputs once; reuse across forward calls."""
    cfg = dict(default_gcn_config() if config is None else config)
    tm, tk, a_dtype = cfg["tm"], cfg["tk"], cfg["a_dtype"]

    n, f = x.shape
    hid = params["w1"].shape[1]
    ncls = params["w2"].shape[1]

    n_pad = _round_up(n, math.lcm(tm, tk))
    f_pad = _round_up(f, 128)
    h_pad = _round_up(hid, 128)
    c_pad = _round_up(ncls, 128)

    a_hat = normalized_adjacency(edge_index, n)
    a_p = _pad2(a_hat, n_pad, n_pad)
    if jnp.issubdtype(jnp.dtype(a_dtype), jnp.integer):
        amax = float(jnp.max(jnp.abs(a_p)))
        scale = 127.0 / max(amax, 1e-12)
        a_p = jnp.round(a_p * scale).astype(jnp.int8)
        a_inv_scale = 1.0 / scale
    else:
        a_p = a_p.astype(a_dtype)
        a_inv_scale = 1.0

    return dict(
        a=a_p,
        x=_pad2(x, n_pad, f_pad).astype(jnp.bfloat16),
        w1=_pad2(params["w1"], f_pad, h_pad).astype(jnp.bfloat16),
        w2=_pad2(params["w2"], h_pad, c_pad).astype(jnp.bfloat16),
        b1=_pad2(params["b1"].reshape(1, -1).astype(jnp.float32), 1, h_pad),
        b2=_pad2(params["b2"].reshape(1, -1).astype(jnp.float32), 1, c_pad),
        n=n, ncls=ncls,
        n_pad=n_pad, f_pad=f_pad, h_pad=h_pad, c_pad=c_pad,
        tm=tm, tk=tk, a_inv_scale=float(a_inv_scale),
    )


# ----------------------------------------------------------------------------
# Forward pass
# ----------------------------------------------------------------------------
def gcn_forward(prep, *, dropout_p=0.5, training=False, rng=None):
    tm, tk = prep["tm"], prep["tk"]
    n_pad, f_pad = prep["n_pad"], prep["f_pad"]
    h_pad, c_pad = prep["h_pad"], prep["c_pad"]
    nb = n_pad // tm
    kb = n_pad // tk
    a_inv_scale = prep["a_inv_scale"]
    a_bytes = n_pad * n_pad * jnp.dtype(prep["a"].dtype).itemsize

    # K-tiling keeps per-step VMEM constant in N -> default VMEM limit is fine
    # on every generation (incl. v7x's 64 MiB); do not raise it.
    cparams_1d = pltpu.CompilerParams(dimension_semantics=("parallel",))
    cparams_2d = pltpu.CompilerParams(
        dimension_semantics=("parallel", "arbitrary"))

    # --- call 1: XW = X @ W1 -------------------------------------------------
    xw = pl.pallas_call(
        _xw_kernel,
        out_shape=jax.ShapeDtypeStruct((n_pad, h_pad), jnp.bfloat16),
        grid=(nb,),
        in_specs=[pl.BlockSpec((tm, f_pad), lambda i: (i, 0)),
                  pl.BlockSpec((f_pad, h_pad), lambda i: (0, 0))],
        out_specs=pl.BlockSpec((tm, h_pad), lambda i: (i, 0)),
        compiler_params=cparams_1d,
        cost_estimate=pl.CostEstimate(
            flops=int(2 * n_pad * f_pad * h_pad),
            transcendentals=0,
            bytes_accessed=int(2 * (n_pad * f_pad + f_pad * h_pad
                                    + n_pad * h_pad))),
    )(prep["x"], prep["w1"])

    # --- call 2: HW = dropout(relu(A @ XW + b1)) @ W2 ------------------------
    use_dropout = bool(training) and float(dropout_p) > 0.0
    inputs2 = [prep["a"], xw, prep["b1"], prep["w2"]]
    in_specs2 = [
        pl.BlockSpec((tm, tk), lambda i, k: (i, k)),          # A tile
        pl.BlockSpec((tk, h_pad), lambda i, k: (k, 0)),       # XW k-slab
        pl.BlockSpec((1, h_pad), lambda i, k: (0, 0)),        # b1
        pl.BlockSpec((h_pad, c_pad), lambda i, k: (0, 0)),    # W2
    ]
    if use_dropout:
        # TODO(synk): dropout mask comes from jax.random (host-side), so it
        # cannot reproduce torch's RNG stream bit-for-bit.
        if rng is None:
            rng = jax.random.PRNGKey(0)
        keep = jax.random.bernoulli(rng, 1.0 - float(dropout_p),
                                    (n_pad, h_pad))
        drop_scale = (keep.astype(jnp.float32)
                      * (1.0 / (1.0 - float(dropout_p)))).astype(jnp.bfloat16)
        inputs2.append(drop_scale)
        in_specs2.append(pl.BlockSpec((tm, h_pad), lambda i, k: (i, 0)))

    hw_kernel = functools.partial(_hw_kernel, a_inv_scale=a_inv_scale,
                                  training=use_dropout)
    hw = pl.pallas_call(
        hw_kernel,
        out_shape=jax.ShapeDtypeStruct((n_pad, c_pad), jnp.bfloat16),
        grid=(nb, kb),
        in_specs=in_specs2,
        out_specs=pl.BlockSpec((tm, c_pad), lambda i, k: (i, 0)),
        scratch_shapes=[pltpu.VMEM((tm, h_pad), jnp.float32)],
        compiler_params=cparams_2d,
        cost_estimate=pl.CostEstimate(
            flops=int(2 * n_pad * n_pad * h_pad + 2 * n_pad * h_pad * c_pad),
            transcendentals=0,
            bytes_accessed=int(a_bytes + 2 * (n_pad * h_pad + h_pad * c_pad
                                              + n_pad * c_pad))),
    )(*inputs2)

    # --- call 3: OUT = A @ HW + b2 -------------------------------------------
    out_kernel = functools.partial(_out_kernel, a_inv_scale=a_inv_scale)
    out = pl.pallas_call(
        out_kernel,
        out_shape=jax.ShapeDtypeStruct((n_pad, c_pad), jnp.float32),
        grid=(nb, kb),
        in_specs=[pl.BlockSpec((tm, tk), lambda i, k: (i, k)),
                  pl.BlockSpec((tk, c_pad), lambda i, k: (k, 0)),
                  pl.BlockSpec((1, c_pad), lambda i, k: (0, 0))],
        out_specs=pl.BlockSpec((tm, c_pad), lambda i, k: (i, 0)),
        scratch_shapes=[pltpu.VMEM((tm, c_pad), jnp.float32)],
        compiler_params=cparams_2d,
        cost_estimate=pl.CostEstimate(
            flops=int(2 * n_pad * n_pad * c_pad),
            transcendentals=0,
            bytes_accessed=int(a_bytes + 2 * n_pad * c_pad
                               + 4 * n_pad * c_pad)),
    )(prep["a"], hw, prep["b2"])

    return out[:prep["n"], :prep["ncls"]]


# ----------------------------------------------------------------------------
# Parameter init (matches torch_geometric GCNConv glorot + zero bias)
# ----------------------------------------------------------------------------
def glorot(key, shape):
    fan_in, fan_out = shape
    limit = (6.0 / (fan_in + fan_out)) ** 0.5
    return jax.random.uniform(key, shape, jnp.float32, -limit, limit)


def init_gcn_params(key, num_features, hidden_dim, num_classes):
    k1, k2 = jax.random.split(key)
    return {
        "w1": glorot(k1, (num_features, hidden_dim)),
        "b1": jnp.zeros((hidden_dim,), jnp.float32),
        "w2": glorot(k2, (hidden_dim, num_classes)),
        "b2": jnp.zeros((num_classes,), jnp.float32),
    }


if __name__ == "__main__":
    # Small synthetic graph consistent with the module's forward:
    #   x: (num_nodes, num_features), edge_index: (2, num_edges)
    N, F_IN, HIDDEN, NUM_CLASSES, E = 16, 8, 32, 4, 40

    key = jax.random.PRNGKey(0)
    kx, ksrc, kdst, kparams, kdrop = jax.random.split(key, 5)

    x = jax.random.normal(kx, (N, F_IN), jnp.float32)
    src = jax.random.randint(ksrc, (E,), 0, N, dtype=jnp.int32)
    dst = jax.random.randint(kdst, (E,), 0, N, dtype=jnp.int32)
    edge_index = jnp.stack([src, dst])

    params = init_gcn_params(kparams, F_IN, HIDDEN, NUM_CLASSES)

    # One-time padded / kernel-dtype preparation (cached across forward calls).
    prep = prepare_gcn(x, edge_index, params)

    # Eval-mode forward (dropout inactive) -> deterministic correctness gate.
    out = gcn_forward(prep, dropout_p=0.5, training=False)
    out = jax.block_until_ready(out)

    # Pure-f32 JAX reference. Tolerance depends on A storage dtype:
    # bf16 fallback is tight; int8/fp8 A (real TPU fast path) is looser.
    a_hat = normalized_adjacency(edge_index, N)
    h_ref = jnp.maximum(a_hat @ (x @ params["w1"]) + params["b1"], 0.0)
    out_ref = a_hat @ (h_ref @ params["w2"]) + params["b2"]
    assert out.shape == (N, NUM_CLASSES)
    quantized_a = prep["a"].dtype != jnp.bfloat16
    tol = 2e-1 if quantized_a else 5e-2
    assert jnp.allclose(out, out_ref, atol=tol, rtol=tol), float(
        jnp.max(jnp.abs(out - out_ref)))

    # Training-mode forward exercises the dropout path (mask precomputed with
    # jax.random, applied in the k==last finalize branch inside the kernel).
    out_train = gcn_forward(prep, dropout_p=0.5, training=True, rng=kdrop)
    out_train = jax.block_until_ready(out_train)
    assert out_train.shape == (N, NUM_CLASSES)
    assert bool(jnp.all(jnp.isfinite(out_train)))

    print("KERNEL_OK")
</pallas_src>

<mosaic_0001>
module attributes {stable_mosaic.version = 11 : i64} {
  func.func @_xw_kernel(%arg0: i32, %arg1: memref<256x128xbf16, #tpu.memory_space<vmem>>, %arg2: memref<128x128xbf16, #tpu.memory_space<vmem>>, %arg3: memref<256x128xbf16, #tpu.memory_space<vmem>>) attributes {dimension_semantics = [#tpu.dimension_semantics<parallel>], iteration_bounds = array<i64: 1>, scalar_prefetch = 0 : i64, scratch_operands = 0 : i64, tpu.core_type = #tpu.core_type<tc>, window_params = [{transform_indices = @transform_0, window_bounds = array<i64: 256, 128>}, {pipeline_mode = #tpu.pipeline_mode<synchronous>, transform_indices = @transform_1, window_bounds = array<i64: 128, 128>}, {transform_indices = @transform_2, window_bounds = array<i64: 256, 128>}]} {
    %c0 = arith.constant 0 : index
    %c0_0 = arith.constant 0 : index
    %0 = vector.load %arg1[%c0, %c0_0] : memref<256x128xbf16, #tpu.memory_space<vmem>>, vector<256x128xbf16>
    %c0_1 = arith.constant 0 : index
    %c0_2 = arith.constant 0 : index
    %1 = vector.load %arg2[%c0_1, %c0_2] : memref<128x128xbf16, #tpu.memory_space<vmem>>, vector<128x128xbf16>
    %cst = arith.constant dense<0.000000e+00> : vector<256x128xf32>
    %2 = tpu.matmul %0, %1, %cst {dimension_numbers = #tpu.dot_dimension_numbers<[1], [0], [0], [1], [0, 0, 1, 1], [], []>} : vector<256x128xbf16>, vector<128x128xbf16>, vector<256x128xf32> -> vector<256x128xf32>
    %3 = arith.truncf %2 : vector<256x128xf32> to vector<256x128xbf16>
    %c0_3 = arith.constant 0 : index
    %c0_4 = arith.constant 0 : index
    %4 = vector.load %arg3[%c0_3, %c0_4] : memref<256x128xbf16, #tpu.memory_space<vmem>>, vector<256x128xbf16>
    tpu.vector_store %arg3[%c0_3, %c0_4], %3 {strides = array<i32>} : memref<256x128xbf16, #tpu.memory_space<vmem>>, vector<256x128xbf16>,
    return
  }
  func.func @transform_0(%arg0: i32) -> (i32, i32) {
    %c0_i32 = arith.constant 0 : i32
    %c0_i32_0 = arith.constant 0 : i32
    return %arg0, %c0_i32 : i32, i32
  }
  func.func @transform_1(%arg0: i32) -> (i32, i32) {
    %c0_i32 = arith.constant 0 : i32
    %c0_i32_0 = arith.constant 0 : i32
    %c0_i32_1 = arith.constant 0 : i32
    return %c0_i32, %c0_i32_0 : i32, i32
  }
  func.func @transform_2(%arg0: i32) -> (i32, i32) {
    %c0_i32 = arith.constant 0 : i32
    %c0_i32_0 = arith.constant 0 : i32
    return %arg0, %c0_i32 : i32, i32
  }
}

</mosaic_0001>

<bundles_post_ra>
// kernel: tpu_custom_call.1
= control target key start
LH: loop header
LB: loop body
LE: loop exit
PB: predicated region body
PF: predicated region fallthrough
CT: control target
= control target key end

     0   :  { %7 = vsyncpa [#allocation3], 0  ;;  %s1009_s0 = inlined_call_operand.hbm [shape: bf16[256,128], index: 0, kind: input, shape index: {}]   ;;  %s1010_s1 = inlined_call_operand.hbm [shape: bf16[128,128], index: 1, kind: input, shape index: {}]   ;;  %s1011_s2 = inlined_call_operand.hbm [shape: bf16[256,128], index: 2, kind: output, shape index: {}]  }
   0x1   :  { %8 = vsyncpa [#allocation6], 0 }
   0x2   :  { %9 = vsyncpa [#allocation4], 0  ;;  %s944_s9 = smov [#allocation2]   ;;  %s872_s13 = scalar_lea.hbm %s1009_s0, 2048 }
   0x3   :  { %s15_s10 = sshll.u32 %s944_s9, 4  ;;  %p873_p0 = scmp.ne.s32.totalorder %s1009_s0, %s872_s13  ;;  %s16_s10 = int_to_ptr.vmem [resolvable:$true] %s15_s10 }
   0x4   :  { %p876_p1 = scmp.lt.u32.totalorder %s872_s13, %s1009_s0 }
   0x6   :  { %p878_p2 = pnand %p876_p1, %p873_p0 }
   0x8   :  { %881 = shalt.err (!%p878_p2)
}
   0x9   :  { %s882_s18 = scalar_lea.vmem %s16_s10, 2048  ;;  %p887_p4 = scmp.lt.s32.totalorder %s16_s10, %s16_s10 }
   0xa   :  { %p883_p3 = scmp.ne.s32.totalorder %s16_s10, %s882_s18  ;;  %p888_p5 = scmp.lt.s32.totalorder %s882_s18, %s882_s18 }
   0xc   :  { %p889_p6 = por %p888_p5, %p887_p4 }
   0xe   :  { %p890_p7 = pnand %p889_p6, %p883_p3 }
  0x10   :  { %893 = shalt.err (!%p890_p7)
}
  0x11   :  { %s945_s19 = smov 64   ;;  %s946_s20 = smov 4  }
  0x12   :  { %21 = dma.hbm_to_vmem [thread:$0]  %s1009_s0, 2048, %s16_s10, [#allocation3], %s945_s19, %s945_s19, %s946_s20  }
  0x13   :  { %s947_s23 = smov [#allocation5]   ;;  %s894_s27 = scalar_lea.hbm %s1010_s1, 1024 }
  0x14   :  { %s27_s24 = sshll.u32 %s947_s23, 4  ;;  %p895_p8 = scmp.ne.s32.totalorder %s1010_s1, %s894_s27  ;;  %s28_s24 = int_to_ptr.vmem [resolvable:$true] %s27_s24 }
  0x15   :  { %p898_p9 = scmp.lt.u32.totalorder %s894_s27, %s1010_s1 }
  0x17   :  { %p900_p10 = pnand %p898_p9, %p895_p8 }
  0x19   :  { %903 = shalt.err (!%p900_p10)
}
  0x1a   :  { %s904_s4 = scalar_lea.vmem %s28_s24, 1024  ;;  %p909_p12 = scmp.lt.s32.totalorder %s28_s24, %s28_s24 }
  0x1b   :  { %p905_p11 = scmp.ne.s32.totalorder %s28_s24, %s904_s4  ;;  %p910_p13 = scmp.lt.s32.totalorder %s904_s4, %s904_s4 }
  0x1d   :  { %p911_p0 = por %p910_p13, %p909_p12 }
  0x1f   :  { %p912_p1 = pnand %p911_p0, %p905_p11 }
  0x21   :  { %915 = shalt.err (!%p912_p1)
}
  0x22   :  { %33 = dma.hbm_to_vmem [thread:$0]  %s1010_s1, 1024, %s28_s24, [#allocation6], %s945_s19, %s945_s19, %s946_s20  }
  0x23   :  { %938 = dma.done.wait [#allocation3], 2048  }
  0x24   :  { %939 = vsyncadd [#allocation3], 4294965248 }
  0x25   :  { %940 = dma.done.wait [#allocation6], 1024  }
  0x26   :  { %941 = vsyncadd [#allocation6], 4294966272  ;;  %v848_v0 = vld [vmem:[#allocation5] sm:$0xff]   ;;  %v849_v1 = vld [vmem:[#allocation5 + $0x8] sm:$0xff]   ;;  %s948_s1 = smov [#allocation7]  }
  0x27   :  { %779 = vmatprep.subr.bf16.mxu0 %v848_v0  ;;  %827 = vmatprep.subr.bf16.mxu1 %v848_v0  ;;  %v850_v2 = vld [vmem:[#allocation5 + $0x10] sm:$0xff]   ;;  %v851_v3 = vld [vmem:[#allocation5 + $0x18] sm:$0xff]   ;;  %v856_v4 = vld [vmem:[#allocation2] sm:$0xff]   ;;  %s559_s6 = sshll.u32 %s948_s1, 4  ;;  %s560_s6 = int_to_ptr.vmem [resolvable:$true] %s559_s6 }
  0x28   :  { %780 = vmatpush3.bf16.msra.mxu0 %v848_v0  ;;  %835 = vmatpush3.bf16.msra.mxu1 %v848_v0  ;;  %v857_v5 = vld [vmem:[#allocation2 + $0x40] sm:$0xff]   ;;  %v853_v7 = vld [vmem:[#allocation5 + $0x28] sm:$0xff]   ;;  %v854_v8 = vld [vmem:[#allocation5 + $0x30] sm:$0xff]   ;;  %s916_s7 = scalar_lea.vmem %s560_s6, 2048  ;;  %p921_p3 = scmp.lt.s32.totalorder %s560_s6, %s560_s6 }
  0x29   :  { %781 = vmatprep.subr.bf16.mxu0 %v849_v1  ;;  %828 = vmatprep.subr.bf16.mxu1 %v849_v1  ;;  %v852_v6 = vld [vmem:[#allocation5 + $0x20] sm:$0xff]   ;;  %v855_v9 = vld [vmem:[#allocation5 + $0x38] sm:$0xff]   ;;  %v858_v10 = vld [vmem:[#allocation2 + $0x8] sm:$0xff]   ;;  %p917_p2 = scmp.ne.s32.totalorder %s560_s6, %s916_s7  ;;  %p922_p4 = scmp.lt.s32.totalorder %s916_s7, %s916_s7 }
  0x2a   :  { %795 = vmatprep.mubr.bf16.mxu0 %v856_v4  ;;  %811 = vmatprep.mubr.bf16.mxu1 %v857_v5  ;;  %v859_v11 = vld [vmem:[#allocation2 + $0x48] sm:$0xff]   ;;  %v860_v12 = vld [vmem:[#allocation2 + $0x10] sm:$0xff]   ;;  %v862_v14 = vld [vmem:[#allocation2 + $0x18] sm:$0xff]  }
  0x2b   :  { %v861_v13 = vld [vmem:[#allocation2 + $0x50] sm:$0xff]   ;;  %v863_v15 = vld [vmem:[#allocation2 + $0x58] sm:$0xff]   ;;  %v864_v16 = vld [vmem:[#allocation2 + $0x20] sm:$0xff]   ;;  %p923_p5 = por %p922_p4, %p921_p3 }
  0x2c   :  { %782 = vmatpush3.bf16.msra.mxu0 %v849_v1  ;;  %836 = vmatpush3.bf16.msra.mxu1 %v849_v1  ;;  %v865_v17 = vld [vmem:[#allocation2 + $0x60] sm:$0xff]   ;;  %v866_v18 = vld [vmem:[#allocation2 + $0x28] sm:$0xff]   ;;  %v868_v20 = vld [vmem:[#allocation2 + $0x30] sm:$0xff]  }
  0x2d   :  { %783 = vmatprep.subr.bf16.mxu0 %v850_v2  ;;  %829 = vmatprep.subr.bf16.mxu1 %v850_v2  ;;  %v867_v19 = vld [vmem:[#allocation2 + $0x68] sm:$0xff]   ;;  %v869_v21 = vld [vmem:[#allocation2 + $0x70] sm:$0xff]   ;;  %v870_v22 = vld [vmem:[#allocation2 + $0x38] sm:$0xff]   ;;  %p924_p6 = pnand %p923_p5, %p917_p2 }
  0x2e   :  { %v871_v23 = vld [vmem:[#allocation2 + $0x78] sm:$0xff]  }
  0x30   :  { %784 = vmatpush3.bf16.msra.mxu0 %v850_v2  ;;  %837 = vmatpush3.bf16.msra.mxu1 %v850_v2 }
  0x31   :  { %785 = vmatprep.subr.bf16.mxu0 %v851_v3  ;;  %830 = vmatprep.subr.bf16.mxu1 %v851_v3 }
  0x34   :  { %786 = vmatpush3.bf16.msra.mxu0 %v851_v3  ;;  %838 = vmatpush3.bf16.msra.mxu1 %v851_v3 }
  0x35   :  { %787 = vmatprep.subr.bf16.mxu0 %v852_v6  ;;  %831 = vmatprep.subr.bf16.mxu1 %v852_v6 }
  0x38   :  { %788 = vmatpush3.bf16.msra.mxu0 %v852_v6  ;;  %839 = vmatpush3.bf16.msra.mxu1 %v852_v6 }
  0x39   :  { %789 = vmatprep.subr.bf16.mxu0 %v853_v7  ;;  %832 = vmatprep.subr.bf16.mxu1 %v853_v7 }
  0x3c   :  { %790 = vmatpush3.bf16.msra.mxu0 %v853_v7  ;;  %840 = vmatpush3.bf16.msra.mxu1 %v853_v7 }
  0x3d   :  { %791 = vmatprep.subr.bf16.mxu0 %v854_v8  ;;  %833 = vmatprep.subr.bf16.mxu1 %v854_v8 }
  0x40   :  { %792 = vmatpush3.bf16.msra.mxu0 %v854_v8  ;;  %841 = vmatpush3.bf16.msra.mxu1 %v854_v8 }
  0x41   :  { %793 = vmatprep.subr.bf16.mxu0 %v855_v9  ;;  %834 = vmatprep.subr.bf16.mxu1 %v855_v9 }
  0x44   :  { %794 = vmatpush3.bf16.msra.mxu0 %v855_v9  ;;  %842 = vmatpush3.bf16.msra.mxu1 %v855_v9 }
  0x47   :  { %796 = vmatmul.mubr.bf16.vlgmr.msra.gmra.mrb[0].mxu0 %v858_v10  ;;  %812 = vmatmul.mubr.bf16.vlgmr.msra.gmra.mrb[0].mxu1 %v859_v11 }
  0x48   :  { %799 = vmatprep.mubr.bf16.mxu0 %v860_v12  ;;  %815 = vmatprep.mubr.bf16.mxu1 %v861_v13 }
  0x4f   :  { %800 = vmatmul.mubr.bf16.gmra.mrb[4].mxu0 %v862_v14  ;;  %816 = vmatmul.mubr.bf16.gmra.mrb[4].mxu1 %v863_v15 }
  0x50   :  { %803 = vmatprep.mubr.bf16.mxu0 %v864_v16  ;;  %819 = vmatprep.mubr.bf16.mxu1 %v865_v17 }
  0x57   :  { %804 = vmatmul.mubr.bf16.gmra.mrb[8].mxu0 %v866_v18  ;;  %820 = vmatmul.mubr.bf16.gmra.mrb[8].mxu1 %v867_v19 }
  0x58   :  { %807 = vmatprep.mubr.bf16.mxu0 %v868_v20  ;;  %823 = vmatprep.mubr.bf16.mxu1 %v869_v21 }
  0x5f   :  { %808 = vmatmul.mubr.bf16.gmra.mrb[12].mxu0 %v870_v22  ;;  %824 = vmatmul.mubr.bf16.gmra.mrb[12].mxu1 %v871_v23 }
 0x11a   :  { %v797_v24 = vpop.f32.mrb[0].mxu0  ;;  %v813_v25 = vpop.f32.mrb[0].mxu1 }
 0x11b   :  { %v267_v26 = vpop.f32.mrb[1].mxu0  ;;  %v331_v27 = vpop.f32.mrb[1].mxu1 }
 0x11c   :  { %v798_v28 = vpop.f32.mrb[2].mxu0  ;;  %v814_v29 = vpop.f32.mrb[2].mxu1 }
 0x11d   :  { %v668_v30 = vpack.c.bf16 %v798_v28, %v797_v24  ;;  %v708_v31 = vpack.c.bf16 %v814_v29, %v813_v25  ;;  %v270_v32 = vpop.f32.mrb[3].mxu0  ;;  %v334_v33 = vpop.f32.mrb[3].mxu1 }
 0x11e   :  { %v663_v34 = vpack.c.bf16 %v270_v32, %v267_v26  ;;  %v703_v35 = vpack.c.bf16 %v334_v33, %v331_v27 }
 0x11f   :  { %740 = vst [vmem:[#allocation7 + $0x8] sm:$0xff] %v668_v30   ;;  %748 = vst [vmem:[#allocation7 + $0x48] sm:$0xff] %v708_v31  }
 0x120   :  { %664 = vst [vmem:[#allocation7] sm:$0xff] %v663_v34   ;;  %747 = vst [vmem:[#allocation7 + $0x40] sm:$0xff] %v703_v35  }
 0x122   :  { %v801_v36 = vpop.f32.mrb[4].mxu0  ;;  %v817_v37 = vpop.f32.mrb[4].mxu1 }
 0x123   :  { %v283_v38 = vpop.f32.mrb[5].mxu0  ;;  %v347_v39 = vpop.f32.mrb[5].mxu1 }
 0x124   :  { %v802_v40 = vpop.f32.mrb[6].mxu0  ;;  %v818_v41 = vpop.f32.mrb[6].mxu1 }
 0x125   :  { %v678_v42 = vpack.c.bf16 %v802_v40, %v801_v36  ;;  %v718_v43 = vpack.c.bf16 %v818_v41, %v817_v37  ;;  %v286_v44 = vpop.f32.mrb[7].mxu0  ;;  %v350_v45 = vpop.f32.mrb[7].mxu1 }
 0x126   :  { %v673_v46 = vpack.c.bf16 %v286_v44, %v283_v38  ;;  %v713_v47 = vpack.c.bf16 %v350_v45, %v347_v39 }
 0x127   :  { %742 = vst [vmem:[#allocation7 + $0x18] sm:$0xff] %v678_v42   ;;  %750 = vst [vmem:[#allocation7 + $0x58] sm:$0xff] %v718_v43  }
 0x128   :  { %741 = vst [vmem:[#allocation7 + $0x10] sm:$0xff] %v673_v46   ;;  %749 = vst [vmem:[#allocation7 + $0x50] sm:$0xff] %v713_v47  }
 0x12a   :  { %v805_v48 = vpop.f32.mrb[8].mxu0  ;;  %v821_v49 = vpop.f32.mrb[8].mxu1 }
 0x12b   :  { %v299_v50 = vpop.f32.mrb[9].mxu0  ;;  %v363_v51 = vpop.f32.mrb[9].mxu1 }
 0x12c   :  { %v806_v52 = vpop.f32.mrb[10].mxu0  ;;  %v822_v53 = vpop.f32.mrb[10].mxu1 }
 0x12d   :  { %v688_v54 = vpack.c.bf16 %v806_v52, %v805_v48  ;;  %v728_v55 = vpack.c.bf16 %v822_v53, %v821_v49  ;;  %v302_v56 = vpop.f32.mrb[11].mxu0  ;;  %v366_v57 = vpop.f32.mrb[11].mxu1 }
 0x12e   :  { %v683_v58 = vpack.c.bf16 %v302_v56, %v299_v50  ;;  %v723_v59 = vpack.c.bf16 %v366_v57, %v363_v51 }
 0x12f   :  { %744 = vst [vmem:[#allocation7 + $0x28] sm:$0xff] %v688_v54   ;;  %752 = vst [vmem:[#allocation7 + $0x68] sm:$0xff] %v728_v55  }
 0x130   :  { %743 = vst [vmem:[#allocation7 + $0x20] sm:$0xff] %v683_v58   ;;  %751 = vst [vmem:[#allocation7 + $0x60] sm:$0xff] %v723_v59  }
 0x132   :  { %v809_v60 = vpop.f32.mrb[12].mxu0  ;;  %v825_v61 = vpop.f32.mrb[12].mxu1 }
 0x133   :  { %v315_v62 = vpop.f32.mrb[13].mxu0  ;;  %v379_v63 = vpop.f32.mrb[13].mxu1 }
 0x134   :  { %v810_v0 = vpop.f32.mrb[14].mxu0  ;;  %v826_v1 = vpop.f32.mrb[14].mxu1 }
 0x135   :  { %v698_v2 = vpack.c.bf16 %v810_v0, %v809_v60  ;;  %v738_v3 = vpack.c.bf16 %v826_v1, %v825_v61  ;;  %v318_v4 = vpop.f32.mrb[15].mxu0  ;;  %v382_v5 = vpop.f32.mrb[15].mxu1 }
 0x136   :  { %v693_v6 = vpack.c.bf16 %v318_v4, %v315_v62  ;;  %v733_v7 = vpack.c.bf16 %v382_v5, %v379_v63 }
 0x137   :  { %746 = vst [vmem:[#allocation7 + $0x38] sm:$0xff] %v698_v2   ;;  %754 = vst [vmem:[#allocation7 + $0x78] sm:$0xff] %v738_v3  }
 0x138   :  { %745 = vst [vmem:[#allocation7 + $0x30] sm:$0xff] %v693_v6   ;;  %753 = vst [vmem:[#allocation7 + $0x70] sm:$0xff] %v733_v7  }
 0x139   :  { %927 = shalt.err (!%p924_p6)
}
 0x13a   :  { %s928_s10 = scalar_lea.hbm %s1011_s2, 2048 }
 0x13b   :  { %p929_p7 = scmp.ne.s32.totalorder %s1011_s2, %s928_s10  ;;  %p932_p8 = scmp.lt.u32.totalorder %s928_s10, %s1011_s2 }
 0x13d   :  { %p934_p9 = pnand %p932_p8, %p929_p7 }
 0x13f   :  { %937 = shalt.err (!%p934_p9)
}
 0x140   :  { %565 = dma.vmem_to_hbm [thread:$0]  %s560_s6, 2048, %s1011_s2, [#allocation4], %s945_s19, %s945_s19, %s946_s20  }
 0x141   :  { %942 = dma.done.wait [#allocation4], 2048  }
 0x142   :  { %943 = vsyncadd [#allocation4], 4294965248 }
 0x143   :  { %569 = vsyncpa [#allocation3], 1 }
 0x144   :  { %570 = vsyncpa [#allocation6], 1 }
 0x145   :  { %571 = vsyncpa [#allocation4], 1 }

</bundles_post_ra>
